<compile_context>
chip_gen: v5e
topology: v5e:2x2
jax: 0.10.0
libtpu: 0.0.40
codegen_flags: <defaults>
</compile_context>

<pallas_src>
from functools import partial

import jax
import jax.numpy as jnp
from jax.experimental import pallas as pl
from jax.experimental.pallas import tpu as pltpu


def time_attention_kernel(x_ref, w_ref, h_ref, o_ref, *, approx_recip):
    # x_ref: (TB, S, K) input dtype | w_ref: (K, N) matmul dtype
    # h_ref: (1, N) f32             | o_ref: (TB, S, N) out dtype
    tb, s_len, k = x_ref.shape
    n = w_ref.shape[1]

    # tanh in f32 (v5e has no bf16 VPU/EUP datapath); the upcast also covers
    # the case where x was DMA'd as bf16 to halve HBM read traffic.
    t = jnp.tanh(x_ref[...].astype(jnp.float32))

    # MXU matmul with f32 accumulation.  The bias b is omitted on purpose: it
    # is constant along the softmax axis (torch dim=0) and cancels exactly
    # after the max-subtraction below.
    # NOTE: the (TB, S, K) -> (TB*S, K) merge is layout-free when S % 8 == 0.
    logits = jnp.dot(
        t.reshape(tb * s_len, k).astype(w_ref.dtype),
        w_ref[...],
        preferred_element_type=jnp.float32,
    ).reshape(tb, s_len, n)

    # Numerically-stable softmax over the sequence axis, entirely in-block.
    logits = logits - jnp.max(logits, axis=1, keepdims=True)
    e = jnp.exp(logits)
    denom = jnp.sum(e, axis=1, keepdims=True)
    if approx_recip:
        inv = pl.reciprocal(denom, approx=True)      # EUP slot, ~free
    else:
        inv = 1.0 / denom                            # exact, for the f32 path
    # Fold H into the (TB, 1, N) scale -> one tiny multiply + one full multiply.
    scale = h_ref[...] * inv
    o_ref[...] = (e * scale).astype(o_ref.dtype)


def _vmem_limits():
    """(tile budget, scoped-vmem limit) sized per TPU generation."""
    try:
        cap = pltpu.get_tpu_info().vmem_capacity_bytes
    except Exception:
        cap = 64 * 1024 * 1024            # assume smallest (v7x) if query fails
    limit = min(cap * 3 // 4, 96 * 1024 * 1024)   # 48 MiB on v7x, 96 MiB v5e/v6e
    budget = limit * 2 // 3                        # headroom for compiler temps
    return budget, limit


def _choose_tile_b(batch, block_bytes, budget, min_steps=4):
    """Largest TB dividing `batch` that fits the VMEM budget while keeping the
    grid >= min_steps steps (both v7x TensorCores + DMA pipeline have work)."""
    tb = max(1, batch // min_steps)
    while tb > 1 and (batch % tb != 0 or block_bytes(tb) > budget):
        tb -= 1
    return tb


def time_attention(x, W, b, H, *, matmul_dtype=jnp.bfloat16, out_dtype=None):
    """x: (S, K) or (B, S, K) -> (S, N) or (B, S, N), matching the module.

    x is DMA'd in whatever dtype it arrives in (pass bf16 x to halve the input
    HBM stream).  No feature-axis padding is done; the MXU pads K/N internally.
    """
    del b  # constant along the softmax axis (dim 0) -> cancels exactly; no DMA.

    orig_ndim = x.ndim
    if x.ndim == 2:
        x = x[None]
    B, S, K = x.shape
    Kw, N = W.shape
    assert Kw == K, f"W first dim {Kw} must match x last dim {K}"
    assert H.shape == (1, N)

    out_dtype = x.dtype if out_dtype is None else out_dtype
    Wm = W.astype(matmul_dtype)
    Hm = H.astype(jnp.float32)

    x_bytes = jnp.dtype(x.dtype).itemsize
    o_bytes = jnp.dtype(out_dtype).itemsize
    w_bytes = jnp.dtype(matmul_dtype).itemsize
    budget, vmem_limit = _vmem_limits()

    def block_bytes(t):
        # double-buffered x/out blocks + ~3 f32 in-kernel temporaries
        # (tanh / logits / exp) + double-buffered (tiny) W and H operands.
        return (2 * t * S * (K * x_bytes + N * o_bytes)
                + 3 * t * S * max(K, N) * 4
                + 2 * (K * N * w_bytes + N * 4))

    TB = _choose_tile_b(B, block_bytes, budget)

    kernel = partial(
        time_attention_kernel,
        approx_recip=jnp.dtype(matmul_dtype) != jnp.dtype(jnp.float32),
    )

    out = pl.pallas_call(
        kernel,
        out_shape=jax.ShapeDtypeStruct((B, S, N), out_dtype),
        grid=(B // TB,),
        in_specs=[
            # Block dims S, K, N equal the full array dims -> exempt from the
            # (8, 128) divisibility rule; no HBM-side padding needed.
            pl.BlockSpec((TB, S, K), lambda i: (i, 0, 0)),
            pl.BlockSpec((K, N), lambda i: (0, 0)),
            pl.BlockSpec((1, N), lambda i: (0, 0)),
        ],
        out_specs=pl.BlockSpec((TB, S, N), lambda i: (i, 0, 0)),
        compiler_params=pltpu.CompilerParams(
            dimension_semantics=("parallel",),   # batch blocks are independent
            vmem_limit_bytes=vmem_limit,
        ),
    )(x, Wm, Hm)

    if orig_ndim == 2:
        out = out[0]
    return out


def time_attention_ref(x, W, b, H):
    s = jnp.tanh(x) @ W + b
    s = jax.nn.softmax(s, axis=0)
    return H * s


if __name__ == "__main__":
    # Shapes consistent with the module: x is (seq_len, input_size)
    seq_len, input_size, out_size = 8, 32, 32

    key = jax.random.PRNGKey(0)
    kx, kw, kb, kh, kxb = jax.random.split(key, 5)

    x = jax.random.normal(kx, (seq_len, input_size), dtype=jnp.float32)
    # Deterministic parameter init mirroring __init__: randn * 0.01
    W = jax.random.normal(kw, (input_size, out_size), dtype=jnp.float32) * 0.01
    b = jax.random.normal(kb, (1, out_size), dtype=jnp.float32) * 0.01
    H = jax.random.normal(kh, (1, out_size), dtype=jnp.float32) * 0.01

    ref = time_attention_ref(x, W, b, H)

    # 1) Module-exact 2-D input, f32 MXU operands, exact reciprocal: tight check.
    out_f32 = jax.block_until_ready(
        time_attention(x, W, b, H, matmul_dtype=jnp.float32))
    assert out_f32.shape == (seq_len, out_size)
    assert jnp.allclose(out_f32, ref, atol=2e-5, rtol=1e-3), \
        float(jnp.max(jnp.abs(out_f32 - ref)))

    # 2) Default fast path (bf16 MXU operands, f32 accumulation, approx recip).
    out_bf16 = jax.block_until_ready(time_attention(x, W, b, H))
    assert jnp.allclose(out_bf16, ref, atol=1e-4, rtol=2e-2)

    # 3) Batched path: many independent (seq, in) problems in one pallas_call,
    #    exercising the parallel / pipelined grid axis (>= 4 steps).
    batch = 16
    xb = jax.random.normal(kxb, (batch, seq_len, input_size), dtype=jnp.float32)
    ref_b = jax.vmap(lambda xi: time_attention_ref(xi, W, b, H))(xb)
    out_b = jax.block_until_ready(time_attention(xb, W, b, H))
    assert out_b.shape == (batch, seq_len, out_size)
    assert jnp.allclose(out_b, ref_b, atol=1e-4, rtol=2e-2)

    # 4) bf16-x DMA + bf16 output: halves both HBM streams of the kernel.
    out_b16 = jax.block_until_ready(
        time_attention(xb.astype(jnp.bfloat16), W, b, H, out_dtype=jnp.bfloat16))
    assert out_b16.dtype == jnp.bfloat16
    assert jnp.allclose(out_b16.astype(jnp.float32), ref_b, atol=3e-3, rtol=5e-2)

    print("KERNEL_OK")
</pallas_src>

<mosaic_0001>
module attributes {stable_mosaic.version = 11 : i64} {
  func.func @time_attention_kernel(%arg0: i32, %arg1: memref<1x8x32xf32, #tpu.memory_space<vmem>>, %arg2: memref<32x32xf32, #tpu.memory_space<vmem>>, %arg3: memref<1x32xf32, #tpu.memory_space<vmem>>, %arg4: memref<1x8x32xf32, #tpu.memory_space<vmem>>) attributes {dimension_semantics = [#tpu.dimension_semantics<parallel>], iteration_bounds = array<i64: 1>, scalar_prefetch = 0 : i64, scratch_operands = 0 : i64, tpu.core_type = #tpu.core_type<tc>, window_params = [{transform_indices = @transform_0, window_bounds = array<i64: 1, 8, 32>}, {pipeline_mode = #tpu.pipeline_mode<synchronous>, transform_indices = @transform_1, window_bounds = array<i64: 32, 32>}, {pipeline_mode = #tpu.pipeline_mode<synchronous>, transform_indices = @transform_2, window_bounds = array<i64: 1, 32>}, {transform_indices = @transform_3, window_bounds = array<i64: 1, 8, 32>}]} {
    %c0 = arith.constant 0 : index
    %c0_0 = arith.constant 0 : index
    %c0_1 = arith.constant 0 : index
    %0 = vector.load %arg1[%c0, %c0_0, %c0_1] : memref<1x8x32xf32, #tpu.memory_space<vmem>>, vector<1x8x32xf32>
    %1 = math.tanh %0 : vector<1x8x32xf32>
    %2 = vector.shape_cast %1 : vector<1x8x32xf32> to vector<8x32xf32>
    %c0_2 = arith.constant 0 : index
    %c0_3 = arith.constant 0 : index
    %3 = vector.load %arg2[%c0_2, %c0_3] : memref<32x32xf32, #tpu.memory_space<vmem>>, vector<32x32xf32>
    %cst = arith.constant dense<0.000000e+00> : vector<8x32xf32>
    %4 = tpu.matmul %2, %3, %cst {dimension_numbers = #tpu.dot_dimension_numbers<[1], [0], [0], [1], [0, 0, 1, 1], [], []>} : vector<8x32xf32>, vector<32x32xf32>, vector<8x32xf32> -> vector<8x32xf32>
    %5 = vector.shape_cast %4 : vector<8x32xf32> to vector<1x8x32xf32>
    %cst_4 = arith.constant dense<0xFF800000> : vector<1x32xf32>
    %6 = vector.multi_reduction <maximumf>, %5, %cst_4 [1] : vector<1x8x32xf32> to vector<1x32xf32>
    %7 = vector.shape_cast %6 : vector<1x32xf32> to vector<1x1x32xf32>
    %8 = vector.broadcast %7 : vector<1x1x32xf32> to vector<1x8x32xf32>
    %9 = arith.subf %5, %8 : vector<1x8x32xf32>
    %10 = math.exp %9 : vector<1x8x32xf32>
    %cst_5 = arith.constant dense<0.000000e+00> : vector<1x32xf32>
    %11 = vector.multi_reduction <add>, %10, %cst_5 [1] : vector<1x8x32xf32> to vector<1x32xf32>
    %12 = vector.shape_cast %11 : vector<1x32xf32> to vector<1x1x32xf32>
    %cst_6 = arith.constant 1.000000e+00 : f32
    %13 = vector.broadcast %cst_6 : f32 to vector<1x1x32xf32>
    %14 = arith.divf %13, %12 : vector<1x1x32xf32>
    %c0_7 = arith.constant 0 : index
    %c0_8 = arith.constant 0 : index
    %15 = vector.load %arg3[%c0_7, %c0_8] : memref<1x32xf32, #tpu.memory_space<vmem>>, vector<1x32xf32>
    %16 = vector.shape_cast %15 : vector<1x32xf32> to vector<1x1x32xf32>
    %17 = arith.mulf %16, %14 : vector<1x1x32xf32>
    %18 = vector.broadcast %17 : vector<1x1x32xf32> to vector<1x8x32xf32>
    %19 = arith.mulf %10, %18 : vector<1x8x32xf32>
    %c0_9 = arith.constant 0 : index
    %c0_10 = arith.constant 0 : index
    %c0_11 = arith.constant 0 : index
    %20 = vector.load %arg4[%c0_9, %c0_10, %c0_11] : memref<1x8x32xf32, #tpu.memory_space<vmem>>, vector<1x8x32xf32>
    tpu.vector_store %arg4[%c0_9, %c0_10, %c0_11], %19 {strides = array<i32>} : memref<1x8x32xf32, #tpu.memory_space<vmem>>, vector<1x8x32xf32>,
    return
  }
  func.func @transform_0(%arg0: i32) -> (i32, i32, i32) {
    %c0_i32 = arith.constant 0 : i32
    %c0_i32_0 = arith.constant 0 : i32
    %c0_i32_1 = arith.constant 0 : i32
    return %arg0, %c0_i32, %c0_i32_0 : i32, i32, i32
  }
  func.func @transform_1(%arg0: i32) -> (i32, i32) {
    %c0_i32 = arith.constant 0 : i32
    %c0_i32_0 = arith.constant 0 : i32
    %c0_i32_1 = arith.constant 0 : i32
    return %c0_i32, %c0_i32_0 : i32, i32
  }
  func.func @transform_2(%arg0: i32) -> (i32, i32) {
    %c0_i32 = arith.constant 0 : i32
    %c0_i32_0 = arith.constant 0 : i32
    %c0_i32_1 = arith.constant 0 : i32
    return %c0_i32, %c0_i32_0 : i32, i32
  }
  func.func @transform_3(%arg0: i32) -> (i32, i32, i32) {
    %c0_i32 = arith.constant 0 : i32
    %c0_i32_0 = arith.constant 0 : i32
    %c0_i32_1 = arith.constant 0 : i32
    return %arg0, %c0_i32, %c0_i32_0 : i32, i32, i32
  }
}

</mosaic_0001>

<bundles_post_ra>
// kernel: tpu_custom_call.1
= control target key start
LH: loop header
LB: loop body
LE: loop exit
PB: predicated region body
PF: predicated region fallthrough
CT: control target
= control target key end

     0   :  { %8 = vsyncpa [#allocation3], 0  ;;  %s263_s0 = inlined_call_operand.hbm [shape: f32[1,8,32], index: 0, kind: input, shape index: {}]   ;;  %s264_s1 = inlined_call_operand.hbm [shape: f32[32,32], index: 1, kind: input, shape index: {}]   ;;  %s265_s2 = inlined_call_operand.vmem [shape: f32[1,32], index: 2, kind: input, shape index: {}]   ;;  %s266_s3 = inlined_call_operand.hbm [shape: f32[1,8,32], index: 3, kind: output, shape index: {}]  }
   0x1   :  { %9 = vsyncpa [#allocation6], 0 }
   0x2   :  { %10 = vsyncpa [#allocation4], 0  ;;  %s16_s14 = sshll.u32 %s263_s0, 4  ;;  %s222_s15 = smov [#allocation2]   ;;  %s17_s14 = int_to_ptr.hbm [resolvable:$true] %s16_s14 }
   0x3   :  { %s18_s16 = sshll.u32 %s222_s15, 4  ;;  %s26_s19 = sshll.u32 %s264_s1, 4  ;;  %s19_s16 = int_to_ptr.vmem [resolvable:$true] %s18_s16  ;;  %s27_s19 = int_to_ptr.hbm [resolvable:$true] %s26_s19 }
   0x4   :  { %21 = dma.hbm_to_vmem [thread:$0]  %s17_s14, 128, %s19_s16, [#allocation3]  }
   0x5   :  { %s223_s20 = smov [#allocation5]   ;;  %s224_s22 = smov 128  }
   0x6   :  { %s28_s21 = sshll.u32 %s223_s20, 4  ;;  %s225_s23 = smov 8   ;;  %s29_s21 = int_to_ptr.vmem [resolvable:$true] %s28_s21 }
   0x7   :  { %34 = dma.hbm_to_vmem [thread:$0]  %s27_s19, 512, %s29_s21, [#allocation6], %s224_s22, %s224_s22, %s225_s23  }
   0x8   :  { %216 = dma.done.wait [#allocation3], 128  }
   0x9   :  { %217 = vsyncadd [#allocation3], 4294967168 }
   0xa   :  { %218 = dma.done.wait [#allocation6], 512  }
   0xb   :  { %219 = vsyncadd [#allocation6], 4294966784  ;;  %v50_v0 = vld [vmem:[#allocation5 + $0x18] sm:$0xff]  ;;  %v49_v1 = vld [vmem:[#allocation5 + $0x10] sm:$0xff]  ;;  %vm51_vm0 = vcmask 261120   ;;  %s226_s24 = smov [#allocation7]  }
   0xc   :  { %67 = vmatpush.msra.mxu0 %v50_v0  ;;  %v45_v2 = vld [vmem:[#allocation2] sm:$0xff]  ;;  %v48_v3 = vld [vmem:[#allocation5 + $0x8] sm:$0xff]  ;;  %v47_v4 = vld [vmem:[#allocation5] sm:$0xff]  ;;  %s119_s25 = sshll.u32 %s226_s24, 4  ;;  %s121_s28 = sshll.u32 %s266_s3, 4  ;;  %s120_s25 = int_to_ptr.vmem [resolvable:$true] %s119_s25  ;;  %s122_s28 = int_to_ptr.hbm [resolvable:$true] %s121_s28 }
   0xd   :  { %138 = vtanh.f32 %v45_v2  ;;  %v107_v32 = vld [vmem:[%s265_s2] sm:$0x1] }
   0xe   :  { %68 = vmatpush.msra.mxu0 %v49_v1 }
  0x10   :  { %69 = vmatpush.msra.mxu0 %v48_v3 }
  0x12   :  { %70 = vmatpush.msra.mxu0 %v47_v4 }
  0x13   :  { %v139_v5 = vpop.eup %138 }
  0x14   :  { %132 = vmatmul.msk.f32.vlgmr.msra.gmra.mxu0 %vm51_vm0, %v139_v5 }
  0x91   :  { %v72_v6 = vpop.f32.mrf.mxu0 }
  0x92   :  { %v75_v7 = vsel %vm51_vm0, %v72_v6, -inf }
  0x93   :  { %v76_v8 = vrot.slane %v75_v7, 4 }
  0x95   :  { %v77_v9 = vmax.f32 %v75_v7, %v76_v8 }
  0x97   :  { %v78_v10 = vrot.slane %v77_v9, 2 }
  0x99   :  { %v79_v11 = vmax.f32 %v77_v9, %v78_v10 }
  0x9b   :  { %v80_v12 = vrot.slane %v79_v11, 1 }
  0x9d   :  { %v81_v13 = vmax.f32 %v79_v11, %v80_v12 }
  0x9f   :  { %v82_v14 = vsub.f32 %v72_v6, %v81_v13 }
  0xa1   :  { %v83_v15 = vmul.f32 1.442695, %v82_v14 }
  0xa3   :  { %140 = vpow2.f32 %v83_v15 }
  0xa9   :  { %v141_v16 = vpop.eup %140 }
  0xaa   :  { %v85_v17 = vsel %vm51_vm0, %v141_v16, 0.0 }
  0xab   :  { %v86_v18 = vrot.slane %v85_v17, 4 }
  0xad   :  { %v87_v19 = vadd.f32 %v86_v18, %v85_v17 }
  0xaf   :  { %v88_v20 = vrot.slane %v87_v19, 2 }
  0xb1   :  { %v89_v21 = vadd.f32 %v88_v20, %v87_v19 }
  0xb3   :  { %v90_v22 = vrot.slane %v89_v21, 1 }
  0xb5   :  { %v91_v23 = vadd.f32 %v90_v22, %v89_v21 }
  0xb7   :  { %142 = vrcp.f32 %v91_v23  ;;  %v103_v27 = vand.u32 2147483648, %v91_v23  ;;  %v101_v29 = vand.u32 2147483647, %v91_v23  ;;  %vm97_vm2 = vweird.f32 %v91_v23 }
  0xb9   :  { %v104_v31 = vor.u32 1.1754944e-38, %v103_v27  ;;  %vm102_vm4 = vcmp.eq.f32.partialorder %v101_v29, 8.507059e+37 }
  0xbd   :  { %v143_v24 = vpop.eup %142 }
  0xbe   :  { %v93_v25 = vmul.f32 %v143_v24, %v91_v23  ;;  %vm98_vm1 = vweird.f32 %v143_v24 }
  0xbf   :  { %vm99_vm3 = vmor %vm97_vm2, %vm98_vm1 }
  0xc0   :  { %v94_v26 = vsub.f32 1.0, %v93_v25 }
  0xc2   :  { %v95_v28 = vmul.f32 %v143_v24, %v94_v26 }
  0xc4   :  { %v96_v30 = vadd.f32 %v143_v24, %v95_v28 }
  0xc6   :  { %v100_v33 = vsel %vm99_vm3, %v143_v24, %v96_v30 }
  0xc7   :  { %v105_v34 = vsel %vm102_vm4, %v104_v31, %v100_v33 }
  0xc8   :  { %v108_v35 = vmul.f32 %v107_v32, %v105_v34 }
  0xca   :  { %v110_v36 = vperm.slane %v108_v35, 0 }
  0xcc   :  { %v112_v37 = vmul.f32 %v141_v16, %v110_v36 }
  0xce   :  { %113 = vst.msk [vmem:[#allocation7] sm:$0xff] %vm51_vm0, %v112_v37 }
  0xcf   :  { %124 = dma.vmem_to_hbm [thread:$0]  %s120_s25, 128, %s122_s28, [#allocation4]  }
  0xd0   :  { %220 = dma.done.wait [#allocation4], 128  }
  0xd1   :  { %221 = vsyncadd [#allocation4], 4294967168 }
  0xd2   :  { %129 = vsyncpa [#allocation3], 1 }
  0xd3   :  { %130 = vsyncpa [#allocation6], 1 }
  0xd4   :  { %131 = vsyncpa [#allocation4], 1 }

</bundles_post_ra>
